<compile_context>
chip_gen: v7x
topology: tpu7x:2x2x1
jax: 0.10.0
libtpu: 0.0.40
codegen_flags: <defaults>
</compile_context>

<pallas_src>
import math
import numpy as np
import jax
import jax.numpy as jnp
from jax import lax
from jax.experimental import pallas as pl
from jax.experimental.pallas import tpu as pltpu

LN_EPS = 1e-5
_INV_SQRT2 = 0.7071067811865476


# ----------------------------------------------------------------------------
# Pallas kernel
# ----------------------------------------------------------------------------
def _make_mlp_kernel(pack):
    """Linear(3H->H) -> LayerNorm(H) -> GELU(erf) -> Linear(H->H).

    pack > 1: `pack` logical rows are packed along the lane axis (pack*H == 128);
    W1/W2 are block-diagonal, LayerNorm statistics per H-lane group come from a
    small per-group averaging matmul (m_ref).  pack == 1: standard row-wise LN.
    """
    if pack > 1:
        def kernel(x_ref, w1_ref, w2_ref, p_ref, m_ref, o_ref):
            x = x_ref[...]                                     # (tm, pack*3H) bf16
            p = p_ref[...]                                     # (4, pack*H)   f32
            h = jnp.dot(x, w1_ref[...],
                        preferred_element_type=jnp.float32) + p[0:1, :]
            # per-group mean / variance via averaging matmul (stays in f32)
            mean = jnp.dot(h, m_ref[...], preferred_element_type=jnp.float32)
            hc = h - mean
            var = jnp.dot(hc * hc, m_ref[...], preferred_element_type=jnp.float32)
            hn = hc * lax.rsqrt(var + LN_EPS) * p[1:2, :] + p[2:3, :]
            ge = 0.5 * hn * (1.0 + lax.erf(hn * _INV_SQRT2))   # exact (erf) GELU
            out = jnp.dot(ge.astype(jnp.bfloat16), w2_ref[...],
                          preferred_element_type=jnp.float32) + p[3:4, :]
            o_ref[...] = out.astype(o_ref.dtype)
    else:
        def kernel(x_ref, w1_ref, w2_ref, p_ref, o_ref):
            x = x_ref[...]                                     # (tm, 3H) bf16
            p = p_ref[...]                                     # (4, H)   f32
            h = jnp.dot(x, w1_ref[...],
                        preferred_element_type=jnp.float32) + p[0:1, :]
            mean = jnp.mean(h, axis=-1, keepdims=True)
            hc = h - mean
            var = jnp.mean(hc * hc, axis=-1, keepdims=True)
            hn = hc * lax.rsqrt(var + LN_EPS) * p[1:2, :] + p[2:3, :]
            ge = 0.5 * hn * (1.0 + lax.erf(hn * _INV_SQRT2))
            out = jnp.dot(ge.astype(jnp.bfloat16), w2_ref[...],
                          preferred_element_type=jnp.float32) + p[3:4, :]
            o_ref[...] = out.astype(o_ref.dtype)
    return kernel


def trips_mlp(x, w1, b1, gamma, beta, w2, b2, *, target_block_bytes=4 << 20):
    """x: [rows, 3H] dense triples (no per-graph padding) -> [rows, H] float32."""
    E, threeH = x.shape
    H = w1.shape[1]
    assert threeH == 3 * H

    # Lane packing factor (lane-dense output: pack*H == 128 when H < 128).
    pack = (128 // H) if (H < 128 and 128 % H == 0) else 1
    lane_in = pack * threeH
    lane_out = pack * H

    f32 = jnp.float32
    if pack > 1:
        eye = jnp.eye(pack, dtype=f32)
        w1_k = jnp.kron(eye, w1.astype(f32)).astype(jnp.bfloat16)   # block-diag (pack*3H, pack*H)
        w2_k = jnp.kron(eye, w2.astype(f32)).astype(jnp.bfloat16)   # block-diag (pack*H,  pack*H)
        m_avg = jnp.kron(eye, jnp.full((H, H), 1.0 / H, f32))       # per-group averaging matrix
    else:
        w1_k = w1.astype(jnp.bfloat16)
        w2_k = w2.astype(jnp.bfloat16)
        m_avg = None
    # b1 / gamma / beta / b2 packed into ONE (4, lane_out) parameter slab.
    params = jnp.stack([jnp.tile(b1.astype(f32), pack),
                        jnp.tile(gamma.astype(f32), pack),
                        jnp.tile(beta.astype(f32), pack),
                        jnp.tile(b2.astype(f32), pack)])

    # Row tiling: big row tiles (amortize ~0.35us/step pipeline overhead),
    # bounded by a per-block VMEM budget; tile rows must be a multiple of 8.
    packed_rows = -(-E // pack)
    bytes_per_row = lane_in * 2 + lane_out * 4                  # bf16 in + f32 out
    tm = max(8, min(1024, (target_block_bytes // bytes_per_row) // 8 * 8))
    tm = min(tm, ((packed_rows + 7) // 8) * 8)
    padded_packed = ((packed_rows + tm - 1) // tm) * tm
    n_tiles = padded_packed // tm

    xb = jnp.pad(x.astype(jnp.bfloat16), ((0, padded_packed * pack - E), (0, 0)))
    x_packed = xb.reshape(padded_packed, lane_in)

    kernel = _make_mlp_kernel(pack)
    in_specs = [
        pl.BlockSpec((tm, lane_in), lambda i: (i, 0)),          # activations (tiled over rows)
        # TODO(synk): on v7x with large H, mark the constant-index weight specs
        # single-buffered (pipeline_mode=pl.Buffered(1)) to halve weight VMEM.
        pl.BlockSpec((lane_in, lane_out), lambda i: (0, 0)),    # W1 (block-diagonal)
        pl.BlockSpec((lane_out, lane_out), lambda i: (0, 0)),   # W2 (block-diagonal)
        pl.BlockSpec((4, lane_out), lambda i: (0, 0)),          # [b1; gamma; beta; b2]
    ]
    args = [x_packed, w1_k, w2_k, params]
    if pack > 1:
        in_specs.append(pl.BlockSpec((lane_out, lane_out), lambda i: (0, 0)))  # averaging matrix
        args.append(m_avg)

    out = pl.pallas_call(
        kernel,
        out_shape=jax.ShapeDtypeStruct((padded_packed, lane_out), jnp.float32),
        grid_spec=pltpu.PrefetchScalarGridSpec(
            num_scalar_prefetch=0,
            grid=(n_tiles,),
            in_specs=in_specs,
            out_specs=pl.BlockSpec((tm, lane_out), lambda i: (i, 0)),
        ),
        compiler_params=pltpu.CompilerParams(
            dimension_semantics=("parallel",),      # row tiles shard over v7x's 2 TCs
            vmem_limit_bytes=48 * 1024 * 1024),
    )(*args)

    # Lane-packed (padded_packed, pack*H) -> (rows, H); drop the padding rows.
    return out.reshape(padded_packed * pack, H)[:E]


# ----------------------------------------------------------------------------
# Module glue (vectorized; host-side numpy index prep only)
# ----------------------------------------------------------------------------
def _mlp_pad_row(w1, b1, gamma, beta, w2, b2):
    """MLP applied to an all-zero [h|r|t] row == value of padded output slots."""
    h = b1.astype(jnp.float32)                      # 0 @ W1 + b1
    mean = jnp.mean(h)
    hc = h - mean
    var = jnp.mean(hc * hc)
    hn = hc * lax.rsqrt(var + LN_EPS) * gamma + beta
    ge = 0.5 * hn * (1.0 + lax.erf(hn * _INV_SQRT2))
    return jnp.dot(ge.astype(jnp.bfloat16), w2.astype(jnp.bfloat16),
                   preferred_element_type=jnp.float32) + b2       # (H,)


def kg_adapter_trips_encoder(node_x, batch_ids, edge_index_local_per_graph,
                             edge_rep, num_edges,
                             w1, b1, gamma, beta, w2, b2):
    """
    node_x:   [num_nodes_total, H]  (sg.x)        — nodes grouped by graph (PyG order)
    batch_ids: per-node graph id                  (sg.batch)
    edge_index_local_per_graph: list of np arrays [2, n_e] of LOCAL node ids
    edge_rep: [num_edges_total, H]                (sg.edge_rep), graph-ordered
    num_edges: per-graph edge counts              (sg.num_edges)
    returns (batch_trip_reps [bsz, T, H] f32, batch_trip_mask [bsz, T] f32)
    """
    H = node_x.shape[1]
    bsz = len(num_edges)
    num_edges = np.asarray(num_edges, np.int64)
    T = int(num_edges.max())

    # ---- host-side numpy index prep (no per-graph device dispatch) ----
    batch_ids = np.asarray(batch_ids)
    counts = np.bincount(batch_ids, minlength=bsz)
    node_off = np.concatenate([[0], np.cumsum(counts)[:-1]]).astype(np.int64)
    head_ids = np.concatenate([edge_index_local_per_graph[b][0] + node_off[b]
                               for b in range(bsz)]).astype(np.int32)
    tail_ids = np.concatenate([edge_index_local_per_graph[b][1] + node_off[b]
                               for b in range(bsz)]).astype(np.int32)
    E = int(num_edges.sum())

    edge_off = np.concatenate([[0], np.cumsum(num_edges)[:-1]]).astype(np.int64)
    pos = np.arange(T)
    mask_np = pos[None, :] < num_edges[:, None]                       # (bsz, T) bool
    scatter_idx = np.where(mask_np, edge_off[:, None] + pos[None, :], 0).astype(np.int32)

    # ---- ONE fused gather (heads + tails) -> dense [E, 3H] slab (real triples only) ----
    ht_ids = jnp.asarray(np.concatenate([head_ids, tail_ids]))
    ht_rep = jnp.take(node_x, ht_ids, axis=0)                         # (2E, H)
    trips = jnp.concatenate([ht_rep[:E], edge_rep[:E], ht_rep[E:]], axis=-1)   # (E, 3H)

    # ---- Pallas MLP on real rows only ----
    dense_out = trips_mlp(trips, w1, b1, gamma, beta, w2, b2)         # (E, H)

    # ---- scatter to padded [bsz, T, H]; padded slots get MLP(0) (matches torch) ----
    pad_out = _mlp_pad_row(w1, b1, gamma, beta, w2, b2)
    mask = jnp.asarray(mask_np.astype(np.float32))
    out = jnp.where(mask[:, :, None] > 0,
                    jnp.take(dense_out, jnp.asarray(scatter_idx), axis=0),
                    pad_out[None, None, :])
    return out.astype(jnp.float32), mask


# ----------------------------------------------------------------------------
# Pure-JAX reference (mirrors the kernel's bf16-matmul / f32-elementwise policy)
# ----------------------------------------------------------------------------
def _reference_mlp(x, w1, b1, gamma, beta, w2, b2):
    h = jnp.dot(x.astype(jnp.bfloat16), w1.astype(jnp.bfloat16),
                preferred_element_type=jnp.float32) + b1
    mean = jnp.mean(h, -1, keepdims=True)
    var = jnp.mean((h - mean) ** 2, -1, keepdims=True)
    hn = (h - mean) * lax.rsqrt(var + LN_EPS) * gamma + beta
    ge = 0.5 * hn * (1.0 + lax.erf(hn * _INV_SQRT2))
    return jnp.dot(ge.astype(jnp.bfloat16), w2.astype(jnp.bfloat16),
                   preferred_element_type=jnp.float32) + b2


if __name__ == "__main__":
    H = 32                        # config.kg_adapter_hidden_size
    bsz = 2

    key = jax.random.PRNGKey(0)
    ks = jax.random.split(key, 8)

    # Synthetic graph batch: graph 0: 5 nodes / 6 edges; graph 1: 4 nodes / 8 edges.
    num_nodes = [5, 4]
    num_edges = [6, 8]
    total_nodes = sum(num_nodes)
    total_edges = sum(num_edges)
    T = max(num_edges)

    node_x = jax.random.normal(ks[0], (total_nodes, H), jnp.float32)     # sg.x
    edge_rep = jax.random.normal(ks[1], (total_edges, H), jnp.float32)   # sg.edge_rep
    batch_ids = np.array([0] * num_nodes[0] + [1] * num_nodes[1])        # sg.batch

    rng = np.random.RandomState(0)
    edge_index_local = [
        np.stack([rng.randint(0, num_nodes[b], size=num_edges[b]),
                  rng.randint(0, num_nodes[b], size=num_edges[b])])
        for b in range(bsz)
    ]

    def _lin_init(k, fan_in, shape):
        bound = 1.0 / math.sqrt(fan_in)
        return jax.random.uniform(k, shape, jnp.float32, -bound, bound)

    w1 = _lin_init(ks[2], 3 * H, (3 * H, H))
    b1 = _lin_init(ks[3], 3 * H, (H,))
    gamma = jnp.ones((H,), jnp.float32)
    beta = jnp.zeros((H,), jnp.float32)
    w2 = _lin_init(ks[4], H, (H, H))
    b2 = _lin_init(ks[5], H, (H,))

    out, mask = kg_adapter_trips_encoder(
        node_x, batch_ids, edge_index_local, edge_rep, num_edges,
        w1, b1, gamma, beta, w2, b2)
    out = jax.block_until_ready(out)
    mask = jax.block_until_ready(mask)

    # ---- reference: literal to_dense_batch-style padded input, then reference MLP ----
    trips_ref = np.zeros((bsz, T, 3 * H), np.float32)
    mask_ref = np.zeros((bsz, T), np.float32)
    node_off = 0
    edge_off = 0
    node_x_np = np.asarray(node_x)
    edge_rep_np = np.asarray(edge_rep)
    for b in range(bsz):
        e = edge_index_local[b]
        n_e = e.shape[1]
        h_r = node_x_np[node_off + e[0]]
        t_r = node_x_np[node_off + e[1]]
        r_r = edge_rep_np[edge_off:edge_off + n_e]
        trips_ref[b, :n_e] = np.concatenate([h_r, r_r, t_r], axis=-1)
        mask_ref[b, :n_e] = 1.0
        node_off += num_nodes[b]
        edge_off += n_e
    ref = _reference_mlp(jnp.asarray(trips_ref), w1, b1, gamma, beta, w2, b2)

    assert out.shape == (bsz, T, H)
    assert mask.shape == (bsz, T)
    np.testing.assert_array_equal(np.asarray(mask), mask_ref)
    np.testing.assert_allclose(np.asarray(out), np.asarray(ref), rtol=2e-2, atol=2e-2)

    print("KERNEL_OK")
</pallas_src>

<mosaic_0001>
module attributes {stable_mosaic.version = 11 : i64} {
  func.func @kernel(%arg0: i32, %arg1: memref<8x384xbf16, #tpu.memory_space<vmem>>, %arg2: memref<384x128xbf16, #tpu.memory_space<vmem>>, %arg3: memref<128x128xbf16, #tpu.memory_space<vmem>>, %arg4: memref<4x128xf32, #tpu.memory_space<vmem>>, %arg5: memref<128x128xf32, #tpu.memory_space<vmem>>, %arg6: memref<8x128xf32, #tpu.memory_space<vmem>>) attributes {dimension_semantics = [#tpu.dimension_semantics<parallel>], iteration_bounds = array<i64: 1>, scalar_prefetch = 0 : i64, scratch_operands = 0 : i64, tpu.core_type = #tpu.core_type<tc>, window_params = [{transform_indices = @transform_0, window_bounds = array<i64: 8, 384>}, {pipeline_mode = #tpu.pipeline_mode<synchronous>, transform_indices = @transform_1, window_bounds = array<i64: 384, 128>}, {pipeline_mode = #tpu.pipeline_mode<synchronous>, transform_indices = @transform_2, window_bounds = array<i64: 128, 128>}, {pipeline_mode = #tpu.pipeline_mode<synchronous>, transform_indices = @transform_3, window_bounds = array<i64: 4, 128>}, {pipeline_mode = #tpu.pipeline_mode<synchronous>, transform_indices = @transform_4, window_bounds = array<i64: 128, 128>}, {transform_indices = @transform_5, window_bounds = array<i64: 8, 128>}]} {
    %c0 = arith.constant 0 : index
    %c0_0 = arith.constant 0 : index
    %0 = vector.load %arg1[%c0, %c0_0] : memref<8x384xbf16, #tpu.memory_space<vmem>>, vector<8x384xbf16>
    %c0_1 = arith.constant 0 : index
    %c0_2 = arith.constant 0 : index
    %1 = vector.load %arg4[%c0_1, %c0_2] : memref<4x128xf32, #tpu.memory_space<vmem>>, vector<4x128xf32>
    %c0_3 = arith.constant 0 : index
    %c0_4 = arith.constant 0 : index
    %2 = vector.load %arg2[%c0_3, %c0_4] : memref<384x128xbf16, #tpu.memory_space<vmem>>, vector<384x128xbf16>
    %cst = arith.constant dense<0.000000e+00> : vector<8x128xf32>
    %3 = tpu.matmul %0, %2, %cst {dimension_numbers = #tpu.dot_dimension_numbers<[1], [0], [0], [1], [0, 0, 1, 1], [], []>} : vector<8x384xbf16>, vector<384x128xbf16>, vector<8x128xf32> -> vector<8x128xf32>
    %4 = vector.extract_strided_slice %1 {offsets = [0, 0], sizes = [1, 128], strides = [1, 1]} : vector<4x128xf32> to vector<1x128xf32>
    %5 = vector.broadcast %4 : vector<1x128xf32> to vector<8x128xf32>
    %6 = arith.addf %3, %5 : vector<8x128xf32>
    %c0_5 = arith.constant 0 : index
    %c0_6 = arith.constant 0 : index
    %7 = vector.load %arg5[%c0_5, %c0_6] : memref<128x128xf32, #tpu.memory_space<vmem>>, vector<128x128xf32>
    %cst_7 = arith.constant dense<0.000000e+00> : vector<8x128xf32>
    %8 = tpu.matmul %6, %7, %cst_7 {dimension_numbers = #tpu.dot_dimension_numbers<[1], [0], [0], [1], [0, 0, 1, 1], [], []>} : vector<8x128xf32>, vector<128x128xf32>, vector<8x128xf32> -> vector<8x128xf32>
    %9 = arith.subf %6, %8 : vector<8x128xf32>
    %10 = arith.mulf %9, %9 : vector<8x128xf32>
    %c0_8 = arith.constant 0 : index
    %c0_9 = arith.constant 0 : index
    %11 = vector.load %arg5[%c0_8, %c0_9] : memref<128x128xf32, #tpu.memory_space<vmem>>, vector<128x128xf32>
    %cst_10 = arith.constant dense<0.000000e+00> : vector<8x128xf32>
    %12 = tpu.matmul %10, %11, %cst_10 {dimension_numbers = #tpu.dot_dimension_numbers<[1], [0], [0], [1], [0, 0, 1, 1], [], []>} : vector<8x128xf32>, vector<128x128xf32>, vector<8x128xf32> -> vector<8x128xf32>
    %cst_11 = arith.constant 9.99999974E-6 : f32
    %13 = vector.broadcast %cst_11 : f32 to vector<8x128xf32>
    %14 = arith.addf %12, %13 : vector<8x128xf32>
    %15 = math.rsqrt %14 : vector<8x128xf32>
    %16 = arith.mulf %9, %15 : vector<8x128xf32>
    %17 = vector.extract_strided_slice %1 {offsets = [1, 0], sizes = [1, 128], strides = [1, 1]} : vector<4x128xf32> to vector<1x128xf32>
    %18 = vector.broadcast %17 : vector<1x128xf32> to vector<8x128xf32>
    %19 = arith.mulf %16, %18 : vector<8x128xf32>
    %20 = vector.extract_strided_slice %1 {offsets = [2, 0], sizes = [1, 128], strides = [1, 1]} : vector<4x128xf32> to vector<1x128xf32>
    %21 = vector.broadcast %20 : vector<1x128xf32> to vector<8x128xf32>
    %22 = arith.addf %19, %21 : vector<8x128xf32>
    %cst_12 = arith.constant 5.000000e-01 : f32
    %23 = vector.broadcast %cst_12 : f32 to vector<8x128xf32>
    %24 = arith.mulf %23, %22 : vector<8x128xf32>
    %cst_13 = arith.constant 0.707106769 : f32
    %25 = vector.broadcast %cst_13 : f32 to vector<8x128xf32>
    %26 = arith.mulf %22, %25 : vector<8x128xf32>
    %27 = math.erf %26 : vector<8x128xf32>
    %cst_14 = arith.constant 1.000000e+00 : f32
    %28 = vector.broadcast %cst_14 : f32 to vector<8x128xf32>
    %29 = arith.addf %28, %27 : vector<8x128xf32>
    %30 = arith.mulf %24, %29 : vector<8x128xf32>
    %31 = arith.truncf %30 : vector<8x128xf32> to vector<8x128xbf16>
    %c0_15 = arith.constant 0 : index
    %c0_16 = arith.constant 0 : index
    %32 = vector.load %arg3[%c0_15, %c0_16] : memref<128x128xbf16, #tpu.memory_space<vmem>>, vector<128x128xbf16>
    %cst_17 = arith.constant dense<0.000000e+00> : vector<8x128xf32>
    %33 = tpu.matmul %31, %32, %cst_17 {dimension_numbers = #tpu.dot_dimension_numbers<[1], [0], [0], [1], [0, 0, 1, 1], [], []>} : vector<8x128xbf16>, vector<128x128xbf16>, vector<8x128xf32> -> vector<8x128xf32>
    %34 = vector.extract_strided_slice %1 {offsets = [3, 0], sizes = [1, 128], strides = [1, 1]} : vector<4x128xf32> to vector<1x128xf32>
    %35 = vector.broadcast %34 : vector<1x128xf32> to vector<8x128xf32>
    %36 = arith.addf %33, %35 : vector<8x128xf32>
    %c0_18 = arith.constant 0 : index
    %c0_19 = arith.constant 0 : index
    %37 = vector.load %arg6[%c0_18, %c0_19] : memref<8x128xf32, #tpu.memory_space<vmem>>, vector<8x128xf32>
    tpu.vector_store %arg6[%c0_18, %c0_19], %36 {strides = array<i32>} : memref<8x128xf32, #tpu.memory_space<vmem>>, vector<8x128xf32>,
    return
  }
  func.func @transform_0(%arg0: i32) -> (i32, i32) {
    %c0_i32 = arith.constant 0 : i32
    %c0_i32_0 = arith.constant 0 : i32
    return %arg0, %c0_i32 : i32, i32
  }
  func.func @transform_1(%arg0: i32) -> (i32, i32) {
    %c0_i32 = arith.constant 0 : i32
    %c0_i32_0 = arith.constant 0 : i32
    %c0_i32_1 = arith.constant 0 : i32
    return %c0_i32, %c0_i32_0 : i32, i32
  }
  func.func @transform_2(%arg0: i32) -> (i32, i32) {
    %c0_i32 = arith.constant 0 : i32
    %c0_i32_0 = arith.constant 0 : i32
    %c0_i32_1 = arith.constant 0 : i32
    return %c0_i32, %c0_i32_0 : i32, i32
  }
  func.func @transform_3(%arg0: i32) -> (i32, i32) {
    %c0_i32 = arith.constant 0 : i32
    %c0_i32_0 = arith.constant 0 : i32
    %c0_i32_1 = arith.constant 0 : i32
    return %c0_i32, %c0_i32_0 : i32, i32
  }
  func.func @transform_4(%arg0: i32) -> (i32, i32) {
    %c0_i32 = arith.constant 0 : i32
    %c0_i32_0 = arith.constant 0 : i32
    %c0_i32_1 = arith.constant 0 : i32
    return %c0_i32, %c0_i32_0 : i32, i32
  }
  func.func @transform_5(%arg0: i32) -> (i32, i32) {
    %c0_i32 = arith.constant 0 : i32
    %c0_i32_0 = arith.constant 0 : i32
    return %arg0, %c0_i32 : i32, i32
  }
}

</mosaic_0001>

<bundles_post_ra>
// kernel: tpu_custom_call.1
= control target key start
LH: loop header
LB: loop body
LE: loop exit
PB: predicated region body
PF: predicated region fallthrough
CT: control target
= control target key end

     0   :  { %10 = vsyncpa [#allocation3], 0  ;;  %s1238_s0 = inlined_call_operand.hbm [shape: bf16[8,384], index: 0, kind: input, shape index: {}]   ;;  %s1239_s1 = inlined_call_operand.hbm [shape: bf16[384,128], index: 1, kind: input, shape index: {}]   ;;  %s1240_s2 = inlined_call_operand.hbm [shape: bf16[128,128], index: 2, kind: input, shape index: {}]   ;;  %s1241_s3 = inlined_call_operand.vmem [shape: f32[4,128], index: 3, kind: input, shape index: {}]   ;;  %s1242_s4 = inlined_call_operand.hbm [shape: f32[128,128], index: 4, kind: input, shape index: {}]   ;;  %s1243_s5 = inlined_call_operand.hbm [shape: f32[8,128], index: 5, kind: output, shape index: {}]  }
   0x1   :  { %11 = vsyncpa [#allocation6], 0 }
   0x2   :  { %12 = vsyncpa [#allocation9], 0 }
   0x3   :  { %13 = vsyncpa [#allocation4], 0  ;;  %s1103_s18 = smov [#allocation5]   ;;  %s985_s22 = scalar_lea.hbm %s1239_s1, 3072 }
   0x4   :  { %s29_s19 = sshll.u32 %s1103_s18, 4  ;;  %p986_p0 = scmp.ne.s32.totalorder %s1239_s1, %s985_s22  ;;  %s30_s19 = int_to_ptr.vmem [resolvable:$true] %s29_s19 }
   0x5   :  { %p989_p1 = scmp.lt.u32.totalorder %s985_s22, %s1239_s1 }
   0x7   :  { %p991_p2 = pnand %p989_p1, %p986_p0 }
   0x9   :  { %994 = shalt.err (!%p991_p2)
}
   0xa   :  { %s995_s27 = scalar_lea.vmem %s30_s19, 3072  ;;  %p1000_p4 = scmp.lt.s32.totalorder %s30_s19, %s30_s19 }
   0xb   :  { %p996_p3 = scmp.ne.s32.totalorder %s30_s19, %s995_s27  ;;  %p1001_p5 = scmp.lt.s32.totalorder %s995_s27, %s995_s27 }
   0xd   :  { %p1002_p6 = por %p1001_p5, %p1000_p4 }
   0xf   :  { %p1003_p7 = pnand %p1002_p6, %p996_p3 }
  0x11   :  { %1006 = shalt.err (!%p1003_p7)
}
  0x12   :  { %s1104_s28 = smov 64   ;;  %s1105_s29 = smov 4  }
  0x13   :  { %35 = dma.hbm_to_vmem [thread:$0]  %s1239_s1, 3072, %s30_s19, [#allocation6], %s1104_s28, %s1104_s28, %s1105_s29  }
  0x14   :  { %s1106_s7 = smov [#allocation2]   ;;  %s1107_s9 = smov [#allocation7]  }
  0x15   :  { %s20_s8 = sshll.u32 %s1106_s7, 4  ;;  %s41_s10 = sshll.u32 %s1107_s9, 4  ;;  %s21_s8 = int_to_ptr.vmem [resolvable:$true] %s20_s8  ;;  %s42_s10 = int_to_ptr.vmem [resolvable:$true] %s41_s10 }
  0x16   :  { %s1007_s13 = scalar_lea.hbm %s1238_s0, 192 }
  0x17   :  { %p1008_p8 = scmp.ne.s32.totalorder %s1238_s0, %s1007_s13  ;;  %p1011_p9 = scmp.lt.u32.totalorder %s1007_s13, %s1238_s0 }
  0x19   :  { %p1013_p10 = pnand %p1011_p9, %p1008_p8 }
  0x1b   :  { %1016 = shalt.err (!%p1013_p10)
}
  0x1c   :  { %s1017_s1 = scalar_lea.vmem %s21_s8, 192  ;;  %p1022_p12 = scmp.lt.s32.totalorder %s21_s8, %s21_s8 }
  0x1d   :  { %p1018_p11 = scmp.ne.s32.totalorder %s21_s8, %s1017_s1  ;;  %p1023_p13 = scmp.lt.s32.totalorder %s1017_s1, %s1017_s1 }
  0x1f   :  { %p1024_p0 = por %p1023_p13, %p1022_p12 }
  0x21   :  { %p1025_p1 = pnand %p1024_p0, %p1018_p11 }
  0x23   :  { %1028 = shalt.err (!%p1025_p1)
}
  0x24   :  { %23 = dma.hbm_to_vmem [thread:$0]  %s1238_s0, 192, %s21_s8, [#allocation3]  }
  0x25   :  { %s1029_s22 = scalar_lea.hbm %s1240_s2, 1024 }
  0x26   :  { %p1030_p2 = scmp.ne.s32.totalorder %s1240_s2, %s1029_s22  ;;  %p1033_p3 = scmp.lt.u32.totalorder %s1029_s22, %s1240_s2 }
  0x28   :  { %p1035_p4 = pnand %p1033_p3, %p1030_p2 }
  0x2a   :  { %1038 = shalt.err (!%p1035_p4)
}
  0x2b   :  { %s1039_s27 = scalar_lea.vmem %s42_s10, 1024  ;;  %p1044_p6 = scmp.lt.s32.totalorder %s42_s10, %s42_s10 }
  0x2c   :  { %p1040_p5 = scmp.ne.s32.totalorder %s42_s10, %s1039_s27  ;;  %p1045_p7 = scmp.lt.s32.totalorder %s1039_s27, %s1039_s27 }
  0x2e   :  { %p1046_p8 = por %p1045_p7, %p1044_p6 }
  0x30   :  { %p1047_p9 = pnand %p1046_p8, %p1040_p5 }
  0x32   :  { %1050 = shalt.err (!%p1047_p9)
}
  0x33   :  { %47 = dma.hbm_to_vmem [thread:$0]  %s1240_s2, 1024, %s42_s10, [#allocation6], %s1104_s28, %s1104_s28, %s1105_s29  }
  0x34   :  { %s1108_s6 = smov [#allocation8]   ;;  %s1051_s11 = scalar_lea.hbm %s1242_s4, 2048 }
  0x35   :  { %s55_s7 = sshll.u32 %s1108_s6, 4  ;;  %p1052_p10 = scmp.ne.s32.totalorder %s1242_s4, %s1051_s11  ;;  %s56_s7 = int_to_ptr.vmem [resolvable:$true] %s55_s7 }
  0x36   :  { %p1055_p11 = scmp.lt.u32.totalorder %s1051_s11, %s1242_s4 }
  0x38   :  { %p1057_p12 = pnand %p1055_p11, %p1052_p10 }
  0x3a   :  { %1060 = shalt.err (!%p1057_p12)
}
  0x3b   :  { %s1061_s16 = scalar_lea.vmem %s56_s7, 2048  ;;  %p1066_p0 = scmp.lt.s32.totalorder %s56_s7, %s56_s7 }
  0x3c   :  { %p1062_p13 = scmp.ne.s32.totalorder %s56_s7, %s1061_s16  ;;  %p1067_p1 = scmp.lt.s32.totalorder %s1061_s16, %s1061_s16 }
  0x3e   :  { %p1068_p2 = por %p1067_p1, %p1066_p0 }
  0x40   :  { %p1069_p3 = pnand %p1068_p2, %p1062_p13 }
  0x42   :  { %1072 = shalt.err (!%p1069_p3)
}
  0x43   :  { %s1109_s2 = smov 128   ;;  %s1110_s28 = smov 8  }
  0x44   :  { %61 = dma.hbm_to_vmem [thread:$0]  %s1242_s4, 2048, %s56_s7, [#allocation9], %s1109_s2, %s1109_s2, %s1110_s28  }
  0x45   :  { %1095 = dma.done.wait [#allocation3], 192  }
  0x46   :  { %1096 = vsyncadd [#allocation3], 4294967104 }
  0x47   :  { %1097 = dma.done.wait [#allocation6], 4096  }
  0x48   :  { %1098 = vsyncadd [#allocation6], 4294963200 }
  0x49   :  { %1099 = dma.done.wait [#allocation9], 2048  }
  0x4a   :  { %1100 = vsyncadd [#allocation9], 4294965248  ;;  %vm1111_vm0 = vmmov 0   ;;  %v1112_v0 = vmov 0.0   ;;  %v946_v1 = vld [vmem:[#allocation5 + $0x40] sm:$0xff]   ;;  %v948_v3 = vld [vmem:[#allocation5 + $0x48] sm:$0xff]   ;;  %v126_v59 = vlaneseq }
  0x4b   :  { %828 = vmatprep.mubr.msk.f32.mxu0 %vm1111_vm0, %v1112_v0  ;;  %v947_v2 = vld [vmem:[#allocation5] sm:$0xff]   ;;  %702 = vmatprep.subr.bf16.mxu1 %v946_v1  ;;  %v949_v4 = vld [vmem:[#allocation5 + $0x8] sm:$0xff]   ;;  %v950_v5 = vld [vmem:[#allocation5 + $0x50] sm:$0xff]   ;;  %v1113_v32 = vmov 0.0|0.0  }
  0x4c   :  { %703 = vmatpush3.bf16.msra.mxu1 %v947_v2  ;;  %v951_v6 = vld [vmem:[#allocation5 + $0x10] sm:$0xff]   ;;  %v952_v7 = vld [vmem:[#allocation5 + $0x58] sm:$0xff]   ;;  %v954_v9 = vld [vmem:[#allocation5 + $0x60] sm:$0xff]   ;;  %886 = vmatprep.subr.bf16.mxu0 %v1113_v32  ;;  %v127_v60 = vshrl.u32 %v126_v59, 7 }
  0x4d   :  { %704 = vmatprep.subr.bf16.mxu1 %v948_v3  ;;  %v953_v8 = vld [vmem:[#allocation5 + $0x18] sm:$0xff]   ;;  %v955_v10 = vld [vmem:[#allocation5 + $0x20] sm:$0xff]   ;;  %v956_v11 = vld [vmem:[#allocation5 + $0x68] sm:$0xff]  }
  0x4e   :  { %v75_v12 = vld [vmem:[#allocation2] sm:$0xff]  ;;  %v957_v14 = vld [vmem:[#allocation5 + $0x28] sm:$0xff]   ;;  %v964_v20 = vld [vmem:[#allocation5 + $0x80] sm:$0xff]   ;;  %v128_v61 = vsub.s32 0, %v127_v60 }
  0x4f   :  { %v668_v13 = vcombine.high %v75_v12, %v75_v12  ;;  %v958_v15 = vld [vmem:[#allocation5 + $0x70] sm:$0xff]   ;;  %v960_v17 = vld [vmem:[#allocation5 + $0x78] sm:$0xff]   ;;  %v667_v19 = vcombine.low %v75_v12, %v75_v12  ;;  %v965_v21 = vld [vmem:[#allocation5 + $0x88] sm:$0xff]  }
  0x50   :  { %705 = vmatpush3.bf16.msra.mxu1 %v949_v4  ;;  %v959_v16 = vld [vmem:[#allocation5 + $0x30] sm:$0xff]   ;;  %v961_v18 = vld [vmem:[#allocation5 + $0x38] sm:$0xff]   ;;  %v968_v24 = vld [vmem:[#allocation5 + $0xa0] sm:$0xff]  }
  0x51   :  { %706 = vmatprep.subr.bf16.mxu1 %v950_v5  ;;  %317 = vmatprep.mubr.bf16.mxu1 %v668_v13  ;;  %v966_v22 = vld [vmem:[#allocation5 + $0x90] sm:$0xff]   ;;  %v967_v23 = vld [vmem:[#allocation5 + $0x98] sm:$0xff]   ;;  %v969_v25 = vld [vmem:[#allocation5 + $0xa8] sm:$0xff]  }
  0x52   :  { %v970_v26 = vld [vmem:[#allocation5 + $0xb0] sm:$0xff]   ;;  %v971_v27 = vld [vmem:[#allocation5 + $0xb8] sm:$0xff]   ;;  %v365_v29 = vld [vmem:[#allocation8] sm:$0xff] }
  0x53   :  { %v972_v28 = vld [vmem:[#allocation2 + $0x8] ss:$0 sps:$4 sm:$0xff]   ;;  %v366_v30 = vld [vmem:[#allocation8 + $0x8] sm:$0xff]  ;;  %v367_v33 = vld [vmem:[#allocation8 + $0x10] sm:$0xff] }
  0x54   :  { %707 = vmatpush3.bf16.msra.mxu1 %v951_v6  ;;  %v887_v31 = vpack.c.bf16 %v366_v30, %v365_v29  ;;  %v368_v34 = vld [vmem:[#allocation8 + $0x18] sm:$0xff]  ;;  %v369_v36 = vld [vmem:[#allocation8 + $0x20] sm:$0xff]  ;;  %v370_v37 = vld [vmem:[#allocation8 + $0x28] sm:$0xff] }
  0x55   :  { %708 = vmatprep.subr.bf16.mxu1 %v952_v7  ;;  %v890_v35 = vpack.c.bf16 %v368_v34, %v367_v33  ;;  %v893_v38 = vpack.c.bf16 %v370_v37, %v369_v36  ;;  %v371_v39 = vld [vmem:[#allocation8 + $0x30] sm:$0xff]  ;;  %v372_v40 = vld [vmem:[#allocation8 + $0x38] sm:$0xff]  ;;  %v373_v42 = vld [vmem:[#allocation8 + $0x40] sm:$0xff] }
  0x56   :  { %888 = vmatpush3.bf16.msra.mxu0 %v887_v31  ;;  %v896_v41 = vpack.c.bf16 %v372_v40, %v371_v39  ;;  %v374_v43 = vld [vmem:[#allocation8 + $0x48] sm:$0xff]  ;;  %v375_v45 = vld [vmem:[#allocation8 + $0x50] sm:$0xff]  ;;  %v376_v46 = vld [vmem:[#allocation8 + $0x58] sm:$0xff] }
  0x57   :  { %889 = vmatprep.subr.bf16.mxu0 %v1113_v32  ;;  %v899_v44 = vpack.c.bf16 %v374_v43, %v373_v42  ;;  %v902_v47 = vpack.c.bf16 %v376_v46, %v375_v45  ;;  %v377_v48 = vld [vmem:[#allocation8 + $0x60] sm:$0xff]  ;;  %v378_v49 = vld [vmem:[#allocation8 + $0x68] sm:$0xff]  ;;  %v379_v51 = vld [vmem:[#allocation8 + $0x70] sm:$0xff] }
  0x58   :  { %709 = vmatpush3.bf16.msra.mxu1 %v953_v8  ;;  %v905_v50 = vpack.c.bf16 %v378_v49, %v377_v48  ;;  %v380_v52 = vld [vmem:[#allocation8 + $0x78] sm:$0xff]  ;;  %v77_v62 = vld [vmem:[%s1241_s3] sm:$0xf]  ;;  %v974_v12 = vld [vmem:[#allocation7 + $0x8] sm:$0xff]   ;;  %s1114_s3 = smov [#allocation10]  }
  0x59   :  { %710 = vmatprep.subr.bf16.mxu1 %v954_v9  ;;  %v908_v53 = vpack.c.bf16 %v380_v52, %v379_v51  ;;  %v129_v63 = vrot.slane %v77_v62, %v128_v61  ;;  %v975_v13 = vld [vmem:[#allocation7 + $0x10] sm:$0xff]   ;;  %s656_s1 = sshll.u32 %s1114_s3, 4  ;;  %s657_s1 = int_to_ptr.vmem [resolvable:$true] %s656_s1 }
  0x5a   :  { %891 = vmatpush3.bf16.msra.mxu0 %v890_v35  ;;  %s1073_s18 = scalar_lea.vmem %s657_s1, 128  ;;  %p1078_p5 = scmp.lt.s32.totalorder %s657_s1, %s657_s1 }
  0x5b   :  { %892 = vmatprep.subr.bf16.mxu0 %v1113_v32  ;;  %p1074_p4 = scmp.ne.s32.totalorder %s657_s1, %s1073_s18  ;;  %p1079_p6 = scmp.lt.s32.totalorder %s1073_s18, %s1073_s18 }
  0x5c   :  { %711 = vmatpush3.bf16.msra.mxu1 %v955_v10 }
  0x5d   :  { %712 = vmatprep.subr.bf16.mxu1 %v956_v11  ;;  %v973_v11 = vld [vmem:[#allocation7] sm:$0xff]   ;;  %p1080_p7 = por %p1079_p6, %p1078_p5 }
  0x5e   :  { %894 = vmatpush3.bf16.msra.mxu0 %v893_v38 }
  0x5f   :  { %895 = vmatprep.subr.bf16.mxu0 %v1113_v32  ;;  %p1081_p8 = pnand %p1080_p7, %p1074_p4 }
  0x60   :  { %713 = vmatpush3.bf16.msra.mxu1 %v957_v14  ;;  %v976_v14 = vld [vmem:[#allocation7 + $0x18] sm:$0xff]  }
  0x61   :  { %714 = vmatprep.subr.bf16.mxu1 %v958_v15  ;;  %v977_v15 = vld [vmem:[#allocation7 + $0x20] sm:$0xff]  }
  0x62   :  { %897 = vmatpush3.bf16.msra.mxu0 %v896_v41 }
  0x63   :  { %898 = vmatprep.subr.bf16.mxu0 %v1113_v32 }
  0x64   :  { %715 = vmatpush3.bf16.msra.mxu1 %v959_v16  ;;  %v978_v16 = vld [vmem:[#allocation7 + $0x28] sm:$0xff]  }
  0x65   :  { %716 = vmatprep.subr.bf16.mxu1 %v960_v17  ;;  %v979_v17 = vld [vmem:[#allocation7 + $0x30] sm:$0xff]  }
  0x66   :  { %900 = vmatpush3.bf16.msra.mxu0 %v899_v44 }
  0x67   :  { %901 = vmatprep.subr.bf16.mxu0 %v1113_v32 }
  0x68   :  { %717 = vmatpush3.bf16.msra.mxu1 %v961_v18  ;;  %v980_v18 = vld [vmem:[#allocation7 + $0x38] sm:$0xff]  }
  0x69   :  { %776 = vmatprep.subr.bf16.mxu1 %v1112_v0 }
  0x6a   :  { %903 = vmatpush3.bf16.msra.mxu0 %v902_v47 }
  0x6b   :  { %318 = vmatmul.mubr.bf16.vlgmr.msra.gmra.mrb[0].mxu1 %v667_v19  ;;  %904 = vmatprep.subr.bf16.mxu0 %v1113_v32 }
  0x6c   :  { %777 = vmatpush3.bf16.msra.mxu1 %v964_v20  ;;  %792 = vmatprep.mubr.msk.bf16.mxu1 %vm1111_vm0, %v1112_v0 }
  0x6d   :  { %778 = vmatprep.subr.bf16.mxu1 %v1112_v0 }
  0x6e   :  { %906 = vmatpush3.bf16.msra.mxu0 %v905_v50 }
  0x6f   :  { %907 = vmatprep.subr.bf16.mxu0 %v1113_v32 }
  0x70   :  { %779 = vmatpush3.bf16.msra.mxu1 %v965_v21 }
  0x71   :  { %780 = vmatprep.subr.bf16.mxu1 %v1112_v0 }
  0x72   :  { %909 = vmatpush3.bf16.msra.mxu0 %v908_v53 }
  0x73   :  { %866 = vmatprep.subr.bf16.mxu0 %v1112_v0 }
  0x74   :  { %781 = vmatpush3.bf16.msra.mxu1 %v966_v22  ;;  %v527_v22 = vsub.s32 1, %v127_v60 }
  0x75   :  { %782 = vmatprep.subr.bf16.mxu1 %v1112_v0 }
  0x78   :  { %783 = vmatpush3.bf16.msra.mxu1 %v967_v23  ;;  %v532_v23 = vsub.s32 2, %v127_v60 }
  0x79   :  { %784 = vmatprep.subr.bf16.mxu1 %v1112_v0 }
  0x7c   :  { %785 = vmatpush3.bf16.msra.mxu1 %v968_v24  ;;  %v528_v24 = vrot.slane %v77_v62, %v527_v22 }
  0x7d   :  { %786 = vmatprep.subr.bf16.mxu1 %v1112_v0 }
  0x80   :  { %787 = vmatpush3.bf16.msra.mxu1 %v969_v25 }
  0x81   :  { %788 = vmatprep.subr.bf16.mxu1 %v1112_v0 }
  0x84   :  { %789 = vmatpush3.bf16.msra.mxu1 %v970_v26  ;;  %v533_v26 = vrot.slane %v77_v62, %v532_v23 }
  0x85   :  { %790 = vmatprep.subr.bf16.mxu1 %v1112_v0 }
  0x88   :  { %791 = vmatpush3.bf16.msra.mxu1 %v971_v27 }
  0x89   :  { %910 = vmatprep.subr.bf16.mxu1 %v1113_v32 }
  0x8b   :  { %793 = vmatmul.mubr.bf16.vlgmr.msra.gmra.mrb[4].mxu1 %v972_v28 }
  0x8c   :  { %863 = vmatprep.mubr.msk.f32.mxu1 %vm1111_vm0, %v1112_v0  ;;  %912 = vmatpush3.bf16.msra.mxu1 %v887_v31 }
  0x8d   :  { %913 = vmatprep.subr.bf16.mxu1 %v1113_v32 }
  0x90   :  { %915 = vmatpush3.bf16.msra.mxu1 %v890_v35  ;;  %v559_v35 = vsub.s32 3, %v127_v60 }
  0x91   :  { %916 = vmatprep.subr.bf16.mxu1 %v1113_v32 }
  0x92   :  { %v560_v36 = vrot.slane %v77_v62, %v559_v35 }
  0x94   :  { %918 = vmatpush3.bf16.msra.mxu1 %v893_v38 }
  0x95   :  { %919 = vmatprep.subr.bf16.mxu1 %v1113_v32 }
  0x98   :  { %921 = vmatpush3.bf16.msra.mxu1 %v896_v41 }
  0x99   :  { %922 = vmatprep.subr.bf16.mxu1 %v1113_v32 }
  0x9c   :  { %924 = vmatpush3.bf16.msra.mxu1 %v899_v44 }
  0x9d   :  { %925 = vmatprep.subr.bf16.mxu1 %v1113_v32 }
  0xa0   :  { %927 = vmatpush3.bf16.msra.mxu1 %v902_v47 }
  0xa1   :  { %928 = vmatprep.subr.bf16.mxu1 %v1113_v32 }
  0xa4   :  { %930 = vmatpush3.bf16.msra.mxu1 %v905_v50 }
  0xa5   :  { %931 = vmatprep.subr.bf16.mxu1 %v1113_v32 }
  0xa8   :  { %933 = vmatpush3.bf16.msra.mxu1 %v908_v53 }
 0x13e   :  { %v718_v54 = vpop.f32.mrb[0].mxu1 }
 0x13f   :  { %v719_v55 = vpop.f32.mrb[1].mxu1 }
 0x140   :  { %v720_v56 = vadd.f32 %v719_v55, %v718_v54  ;;  %v721_v57 = vpop.f32.mrb[2].mxu1 }
 0x141   :  { %v722_v58 = vpop.f32.mrb[3].mxu1 }
 0x142   :  { %v320_v1 = vadd.f32 %v720_v56, %v129_v63 }
 0x15e   :  { %v359_v2 = vpop.f32.mrb[4].mxu1 }
 0x15f   :  { %v360_v3 = vadd.f32 %v359_v2, %v320_v1  ;;  %v794_v4 = vpop.f32.mrb[5].mxu1 }
 0x160   :  { %v362_v5 = vpop.f32.mrb[6].mxu1 }
 0x161   :  { %v795_v6 = vpop.f32.mrb[7].mxu1  ;;  %829 = vmatmul.mubr.f32.vlgmr.msra.gmra.mrb[0].mxu0 %v360_v3 }
 0x162   :  { %882 = vmatprep.mubr.msk.bf16.mxu0 %vm1111_vm0, %v1112_v0  ;;  %867 = vmatpush3.bf16.msra.mxu0 %v973_v11 }
 0x163   :  { %868 = vmatprep.subr.bf16.mxu0 %v1112_v0 }
 0x166   :  { %869 = vmatpush3.bf16.msra.mxu0 %v974_v12 }
 0x167   :  { %870 = vmatprep.subr.bf16.mxu0 %v1112_v0 }
 0x16a   :  { %871 = vmatpush3.bf16.msra.mxu0 %v975_v13 }
 0x16b   :  { %872 = vmatprep.subr.bf16.mxu0 %v1112_v0 }
 0x16e   :  { %873 = vmatpush3.bf16.msra.mxu0 %v976_v14 }
 0x16f   :  { %874 = vmatprep.subr.bf16.mxu0 %v1112_v0 }
 0x172   :  { %875 = vmatpush3.bf16.msra.mxu0 %v977_v15 }
 0x173   :  { %876 = vmatprep.subr.bf16.mxu0 %v1112_v0 }
 0x176   :  { %877 = vmatpush3.bf16.msra.mxu0 %v978_v16 }
 0x177   :  { %878 = vmatprep.subr.bf16.mxu0 %v1112_v0 }
 0x17a   :  { %879 = vmatpush3.bf16.msra.mxu0 %v979_v17 }
 0x17b   :  { %880 = vmatprep.subr.bf16.mxu0 %v1112_v0 }
 0x17e   :  { %881 = vmatpush3.bf16.msra.mxu0 %v980_v18 }
 0x234   :  { %v447_v7 = vpop.f32.mrb[0].mxu0 }
 0x235   :  { %v451_v8 = vsub.f32 %v360_v3, %v447_v7  ;;  %v830_v9 = vpop.f32.mrb[1].mxu0 }
 0x237   :  { %v452_v10 = vmul.f32 %v451_v8, %v451_v8 }
 0x239   :  { %864 = vmatmul.mubr.f32.vlgmr.msra.gmra.mrb[8].mxu1 %v452_v10 }
 0x30c   :  { %v519_v19 = vpop.f32.mrb[8].mxu1 }
 0x30d   :  { %v520_v20 = vadd.f32 1e-05, %v519_v19  ;;  %v865_v21 = vpop.f32.mrb[9].mxu1 }
 0x30f   :  { %981 = vrsqrt.f32 %v520_v20 }
 0x319   :  { %v982_v25 = vpop.eup %981 }
 0x31a   :  { %v524_v27 = vmul.f32 %v982_v25, %v451_v8 }
 0x31c   :  { %v529_v28 = vmul.f32 %v528_v24, %v524_v27 }
 0x31e   :  { %v534_v29 = vadd.f32 %v533_v26, %v529_v28 }
 0x320   :  { %v536_v30 = vmul.f32 0.70710677, %v534_v29  ;;  %v535_v32 = vmul.f32 0.5, %v534_v29 }
 0x322   :  { %983 = verf.f32 %v536_v30 }
 0x32c   :  { %v984_v31 = vpop.eup %983 }
 0x32d   :  { %v538_v33 = vadd.f32 1.0, %v984_v31 }
 0x32f   :  { %v539_v34 = vmul.f32 %v538_v33, %v535_v32 }
 0x331   :  { %v540_v0 = vpack.c.bf16 %v539_v34, %v539_v34 }
 0x333   :  { %883 = vmatmul.mubr.bf16.vlgmr.msra.gmra.mrb[4].mxu0 %v540_v0 }
 0x406   :  { %v643_v37 = vpop.f32.mrb[4].mxu0 }
 0x407   :  { %v644_v38 = vadd.f32 %v643_v37, %v560_v36  ;;  %v884_v39 = vpop.f32.mrb[5].mxu0 }
 0x408   :  { %v646_v40 = vpop.f32.mrb[6].mxu0 }
 0x409   :  { %649 = vst [vmem:[#allocation10] sm:$0xff] %v644_v38  ;;  %v885_v41 = vpop.f32.mrb[7].mxu0 }
 0x40a   :  { %1084 = shalt.err (!%p1081_p8)
}
 0x40b   :  { %s1085_s21 = scalar_lea.hbm %s1243_s5, 128 }
 0x40c   :  { %p1086_p9 = scmp.ne.s32.totalorder %s1243_s5, %s1085_s21  ;;  %p1089_p10 = scmp.lt.u32.totalorder %s1085_s21, %s1243_s5 }
 0x40e   :  { %p1091_p11 = pnand %p1089_p10, %p1086_p9 }
 0x410   :  { %1094 = shalt.err (!%p1091_p11)
}
 0x411   :  { %659 = dma.vmem_to_hbm [thread:$0]  %s657_s1, 128, %s1243_s5, [#allocation4]  }
 0x412   :  { %1101 = dma.done.wait [#allocation4], 128  }
 0x413   :  { %1102 = vsyncadd [#allocation4], 4294967168 }
 0x414   :  { %663 = vsyncpa [#allocation3], 1 }
 0x415   :  { %664 = vsyncpa [#allocation6], 1 }
 0x416   :  { %665 = vsyncpa [#allocation9], 1 }
 0x417   :  { %666 = vsyncpa [#allocation4], 1 }

</bundles_post_ra>
